<compile_context>
chip_gen: v7x
topology: tpu7x:2x2x1
jax: 0.10.0
libtpu: 0.0.40
codegen_flags: <defaults>
</compile_context>

<pallas_src>
import jax
import jax.numpy as jnp
from jax.experimental import pallas as pl
from jax.experimental.pallas import tpu as pltpu


def _round_up(x, m):
    return ((x + m - 1) // m) * m


def _vmem_limit_bytes():
    try:
        cap = pltpu.get_tpu_info().vmem_capacity_bytes
    except Exception:
        cap = 64 * 1024 * 1024  # conservative: v7x per-TensorCore capacity
    # ~48 MiB on v7x (64 MiB/TC), ~96 MiB on v5e/v6e (128 MiB).
    return min(int(cap * 3 // 4), 100 * 1024 * 1024)


def _tile_bytes(tm, tn, tk, esize):
    # Double-buffered input/output tiles + f32 accumulator + bias tile.
    return (2 * tm * tk * esize          # z tile
            + 2 * tk * tn * esize        # W tile
            + 3 * tm * tn * 4            # out (x2 buffers) + acc scratch
            + 2 * 8 * tn * 4)            # bias (1, tn) rounded to a sublane


def _pick_tile(dim_padded, cap_elems, fits):
    """Largest multiple of 128 dividing dim_padded, <= cap_elems, passing fits()."""
    n128 = dim_padded // 128
    upper = max(1, min(n128, cap_elems // 128))
    for d in range(upper, 0, -1):
        if n128 % d == 0 and fits(d * 128):
            return d * 128
    return 128


# ----------------------------- kernels --------------------------------------

def _matmul_bias_kernel(z_ref, w_ref, b_ref, o_ref):
    # Single K step: no scratch accumulator, no zero-init, no acc->out copy.
    o_ref[...] = (jnp.dot(z_ref[...], w_ref[...],
                          preferred_element_type=jnp.float32)
                  + b_ref[...]).astype(o_ref.dtype)


def _matmul_bias_acc_kernel(z_ref, w_ref, b_ref, o_ref, acc_ref):
    k = pl.program_id(2)
    part = jnp.dot(z_ref[...], w_ref[...], preferred_element_type=jnp.float32)

    @pl.when(k == 0)
    def _():
        acc_ref[...] = part            # direct assign: no tm x tn zero store

    @pl.when(k != 0)
    def _():
        acc_ref[...] += part

    @pl.when(k == pl.num_programs(2) - 1)
    def _():
        o_ref[...] = (acc_ref[...] + b_ref[...]).astype(o_ref.dtype)


def _diag_kernel(z_ref, d_ref, b_ref, o_ref):
    # Top block of W is diag(d): pure VPU elementwise.
    o_ref[...] = (z_ref[...] * d_ref[...] + b_ref[...]).astype(o_ref.dtype)


# --------------------------- parameter setup ---------------------------------

def prepare_params(weight, bias, *, exploit_diag=True, use_bf16=False,
                   max_tile=2048, max_tk=None, tm_cap=512):
    """One-time setup: split / pad / transpose the static weight, pick tiles."""
    N, K = weight.shape
    assert bias.shape == (N,)
    weight = weight.astype(jnp.float32)
    bias = bias.astype(jnp.float32)

    vmem_limit = _vmem_limit_bytes()
    params = {
        "latent_dim": int(K),
        "output_dim": int(N),
        "use_bf16": bool(use_bf16),
        "tm_cap": int(tm_cap),
        "vmem_limit": int(vmem_limit),
    }

    # Exploit the module's construction: top latent x latent block is diagonal.
    split = K if (exploit_diag and N >= K) else 0
    params["split"] = int(split)
    if split:
        params["diag"] = jnp.diagonal(weight[:K, :K]).reshape(1, K)
        params["b_top"] = bias[:K].reshape(1, K)

    n_low = N - split
    params["n_low"] = int(n_low)
    if n_low == 0:
        return params

    esize = 2 if use_bf16 else 4
    budget = vmem_limit - (8 << 20)
    Kp = _round_up(K, 128)
    Np = _round_up(n_low, 128)
    tk_cap = max_tk if max_tk is not None else max_tile
    tk = _pick_tile(Kp, tk_cap,
                    lambda t: _tile_bytes(tm_cap, 128, t, esize) <= budget)
    tn = _pick_tile(Np, max_tile,
                    lambda t: _tile_bytes(tm_cap, t, tk, esize) <= budget)

    # Pad + transpose the static weight ONCE (not per call); zero K-padding
    # keeps the reduction exact.
    w_low = weight[split:, :]
    wp = jnp.pad(w_low, ((0, Np - n_low), (0, Kp - K)))
    wT = jnp.asarray(wp.T)                               # (Kp, Np)
    if use_bf16:
        wT = wT.astype(jnp.bfloat16)
    b_low = jnp.pad(bias[split:], (0, Np - n_low)).reshape(1, Np)

    params.update(dict(wT=wT, b_low=b_low, Kp=int(Kp), Np=int(Np),
                       tk=int(tk), tn=int(tn)))
    return params


# ------------------------------ forward --------------------------------------

def _lower_block_matmul(z, params):
    B, K = z.shape
    Kp, Np, tk, tn = params["Kp"], params["Np"], params["tk"], params["tn"]
    n_low, tm_cap = params["n_low"], params["tm_cap"]
    use_bf16 = params["use_bf16"]

    # M tiling: roughly-equal 8-aligned tiles, as large as VMEM allows, so the
    # full weight is streamed from HBM as few times as possible.
    b8 = _round_up(B, 8)
    m_tiles = max(1, -(-b8 // tm_cap))
    tm = _round_up(-(-b8 // m_tiles), 8)
    Bp = tm * m_tiles
    n_tiles = Np // tn
    # Give v7x's second TensorCore work if the parallel grid would be 1x1.
    if m_tiles == 1 and n_tiles == 1 and tn % 256 == 0:
        tn //= 2
        n_tiles = Np // tn
    nk = Kp // tk

    zp = z if (Bp == B and Kp == K) else jnp.pad(z, ((0, Bp - B), (0, Kp - K)))
    if use_bf16:
        zp = zp.astype(jnp.bfloat16)

    esize = 2 if use_bf16 else 4
    cost = pl.CostEstimate(
        flops=int(2 * Bp * Kp * Np),
        transcendentals=0,
        bytes_accessed=int(Bp * Kp * esize * n_tiles     # z re-read per N tile
                           + Kp * Np * esize * m_tiles   # W re-read per M tile
                           + Np * 4 * m_tiles            # bias
                           + Bp * Np * 4))               # output

    if nk == 1:
        grid = (m_tiles, n_tiles)
        in_specs = [
            pl.BlockSpec((tm, tk), lambda i, j: (i, 0)),
            pl.BlockSpec((tk, tn), lambda i, j: (0, j)),
            pl.BlockSpec((1, tn), lambda i, j: (0, j)),
        ]
        out_spec = pl.BlockSpec((tm, tn), lambda i, j: (i, j))
        scratch = []
        kernel = _matmul_bias_kernel
        dim_sem = ("parallel", "parallel")
    else:
        grid = (m_tiles, n_tiles, nk)
        in_specs = [
            pl.BlockSpec((tm, tk), lambda i, j, k: (i, k)),
            pl.BlockSpec((tk, tn), lambda i, j, k: (k, j)),
            pl.BlockSpec((1, tn), lambda i, j, k: (0, j)),
        ]
        out_spec = pl.BlockSpec((tm, tn), lambda i, j, k: (i, j))
        scratch = [pltpu.VMEM((tm, tn), jnp.float32)]
        kernel = _matmul_bias_acc_kernel
        dim_sem = ("parallel", "parallel", "arbitrary")

    out = pl.pallas_call(
        kernel,
        out_shape=jax.ShapeDtypeStruct((Bp, Np), jnp.float32),
        grid_spec=pltpu.PrefetchScalarGridSpec(
            num_scalar_prefetch=0,
            grid=grid,
            in_specs=in_specs,
            out_specs=out_spec,
            scratch_shapes=scratch,
        ),
        compiler_params=pltpu.CompilerParams(
            dimension_semantics=dim_sem,
            vmem_limit_bytes=params["vmem_limit"]),
        cost_estimate=cost,
    )(zp, params["wT"], params["b_low"])

    if (Bp, Np) != (B, n_low):
        out = out[:B, :n_low]
    return out


def injective_linear_decoder(z, params):
    """z: (B, latent_dim) f32 -> (B, output_dim) f32, matching nn.Linear(z)."""
    B, K = z.shape
    assert K == params["latent_dim"]
    outs = []

    if params["split"]:
        z32 = z.astype(jnp.float32)
        if B * K * 4 <= (8 << 20):
            y_top = pl.pallas_call(
                _diag_kernel,
                out_shape=jax.ShapeDtypeStruct((B, K), jnp.float32),
                compiler_params=pltpu.CompilerParams(
                    vmem_limit_bytes=min(params["vmem_limit"], 64 * 1024 * 1024)),
            )(z32, params["diag"], params["b_top"])
        else:
            # Very large B*K: let XLA fuse the trivial elementwise op instead
            # of staging the whole array through one VMEM-resident kernel.
            y_top = z32 * params["diag"] + params["b_top"]
        outs.append(y_top)

    if params["n_low"]:
        outs.append(_lower_block_matmul(z, params))

    return outs[0] if len(outs) == 1 else jnp.concatenate(outs, axis=1)


# ------------------------- module-equivalent init ----------------------------

def make_params(key, latent_dim, output_dim):
    """Deterministically build W/b matching the module's __init__ construction."""
    assert latent_dim <= output_dim
    k_diag, k_low, k_bias = jax.random.split(key, 3)
    diag_vals = jax.random.uniform(k_diag, (latent_dim,), dtype=jnp.float32)
    matrix = jnp.diag(diag_vals)
    if latent_dim < output_dim:
        lower = jax.random.normal(
            k_low, (output_dim - latent_dim, latent_dim), dtype=jnp.float32)
        matrix = jnp.vstack([matrix, lower])
    assert matrix.shape == (output_dim, latent_dim)
    bound = 1.0 / (latent_dim ** 0.5)
    bias = jax.random.uniform(
        k_bias, (output_dim,), minval=-bound, maxval=bound, dtype=jnp.float32)
    return matrix, bias


if __name__ == "__main__":
    key = jax.random.PRNGKey(0)

    # Case 1: tiny, unaligned shapes (pad path, single-K step, diag split).
    k_z, k_p, key = jax.random.split(key, 3)
    B, latent_dim, output_dim = 2, 32, 64
    z = jax.random.normal(k_z, (B, latent_dim), dtype=jnp.float32)
    weight, bias = make_params(k_p, latent_dim, output_dim)
    params = prepare_params(weight, bias)
    out = jax.block_until_ready(injective_linear_decoder(z, params))
    ref = z @ weight.T + bias
    assert out.shape == (B, output_dim)
    assert jnp.allclose(out, ref, atol=1e-5, rtol=1e-5), "case 1"

    # Case 2: lane-aligned shapes, exact f32 path.
    k_z2, k_p2, key = jax.random.split(key, 3)
    B2, latent2, output2 = 16, 256, 512
    z2 = jax.random.normal(k_z2, (B2, latent2), dtype=jnp.float32)
    w2, b2 = make_params(k_p2, latent2, output2)
    p2 = prepare_params(w2, b2)
    out2 = jax.block_until_ready(injective_linear_decoder(z2, p2))
    ref2 = z2 @ w2.T + b2
    assert out2.shape == (B2, output2)
    assert jnp.allclose(out2, ref2, atol=1e-4, rtol=1e-4), "case 2"

    # Case 3: multi-K-step accumulator path (force a small tk).
    p3 = prepare_params(w2, b2, max_tk=128)
    out3 = jax.block_until_ready(injective_linear_decoder(z2, p3))
    assert jnp.allclose(out3, ref2, atol=1e-4, rtol=1e-4), "case 3"

    # Case 4: opt-in bf16 MXU inputs (f32 accumulate); numerics change slightly.
    p4 = prepare_params(w2, b2, use_bf16=True)
    out4 = jax.block_until_ready(injective_linear_decoder(z2, p4))
    assert jnp.allclose(out4, ref2, atol=0.5, rtol=5e-2), "case 4 (bf16)"

    # Case 5: generic path (no assumption about the diagonal top block).
    p5 = prepare_params(w2, b2, exploit_diag=False)
    out5 = jax.block_until_ready(injective_linear_decoder(z2, p5))
    assert jnp.allclose(out5, ref2, atol=1e-4, rtol=1e-4), "case 5"

    print("KERNEL_OK")
</pallas_src>

<mosaic_0001>
module attributes {stable_mosaic.version = 11 : i64} {
  func.func @_diag_kernel(%arg0: memref<2x32xf32, #tpu.memory_space<vmem>>, %arg1: memref<1x32xf32, #tpu.memory_space<vmem>>, %arg2: memref<1x32xf32, #tpu.memory_space<vmem>>, %arg3: memref<2x32xf32, #tpu.memory_space<vmem>>) attributes {dimension_semantics = [], scalar_prefetch = 0 : i64, scratch_operands = 0 : i64, tpu.core_type = #tpu.core_type<tc>} {
    %c0 = arith.constant 0 : index
    %c0_0 = arith.constant 0 : index
    %0 = vector.load %arg0[%c0, %c0_0] : memref<2x32xf32, #tpu.memory_space<vmem>>, vector<2x32xf32>
    %c0_1 = arith.constant 0 : index
    %c0_2 = arith.constant 0 : index
    %1 = vector.load %arg1[%c0_1, %c0_2] : memref<1x32xf32, #tpu.memory_space<vmem>>, vector<1x32xf32>
    %2 = vector.broadcast %1 : vector<1x32xf32> to vector<2x32xf32>
    %3 = arith.mulf %0, %2 : vector<2x32xf32>
    %c0_3 = arith.constant 0 : index
    %c0_4 = arith.constant 0 : index
    %4 = vector.load %arg2[%c0_3, %c0_4] : memref<1x32xf32, #tpu.memory_space<vmem>>, vector<1x32xf32>
    %5 = vector.broadcast %4 : vector<1x32xf32> to vector<2x32xf32>
    %6 = arith.addf %3, %5 : vector<2x32xf32>
    %c0_5 = arith.constant 0 : index
    %c0_6 = arith.constant 0 : index
    %7 = vector.load %arg3[%c0_5, %c0_6] : memref<2x32xf32, #tpu.memory_space<vmem>>, vector<2x32xf32>
    tpu.vector_store %arg3[%c0_5, %c0_6], %6 {strides = array<i32>} : memref<2x32xf32, #tpu.memory_space<vmem>>, vector<2x32xf32>,
    return
  }
}

</mosaic_0001>

<bundles_post_ra>
// kernel: tpu_custom_call.1
= control target key start
LH: loop header
LB: loop body
LE: loop exit
PB: predicated region body
PF: predicated region fallthrough
CT: control target
= control target key end

     0   :  { %8 = vsyncpa [#allocation3], 0  ;;  %s165_s0 = inlined_call_operand.hbm [shape: f32[2,32], index: 0, kind: input, shape index: {}]   ;;  %s166_s1 = inlined_call_operand.vmem [shape: f32[1,32], index: 1, kind: input, shape index: {}]   ;;  %s167_s2 = inlined_call_operand.vmem [shape: f32[1,32], index: 2, kind: input, shape index: {}]   ;;  %s168_s3 = inlined_call_operand.hbm [shape: f32[2,32], index: 3, kind: output, shape index: {}]  }
   0x1   :  { %9 = vsyncpa [#allocation4], 0  ;;  %s113_s12 = smov [#allocation2]   ;;  %s65_s16 = scalar_lea.hbm %s165_s0, 32 }
   0x2   :  { %s16_s13 = sshll.u32 %s113_s12, 4  ;;  %p66_p0 = scmp.ne.s32.totalorder %s165_s0, %s65_s16  ;;  %s17_s13 = int_to_ptr.vmem [resolvable:$true] %s16_s13 }
   0x3   :  { %p69_p1 = scmp.lt.u32.totalorder %s65_s16, %s165_s0 }
   0x5   :  { %p71_p2 = pnand %p69_p1, %p66_p0 }
   0x7   :  { %74 = shalt.err (!%p71_p2)
}
   0x8   :  { %s75_s21 = scalar_lea.vmem %s17_s13, 32  ;;  %p80_p4 = scmp.lt.s32.totalorder %s17_s13, %s17_s13 }
   0x9   :  { %p76_p3 = scmp.ne.s32.totalorder %s17_s13, %s75_s21  ;;  %p81_p5 = scmp.lt.s32.totalorder %s75_s21, %s75_s21 }
   0xb   :  { %p82_p6 = por %p81_p5, %p80_p4 }
   0xd   :  { %p83_p7 = pnand %p82_p6, %p76_p3 }
   0xf   :  { %86 = shalt.err (!%p83_p7)
}
  0x10   :  { %19 = dma.hbm_to_vmem [thread:$0]  %s165_s0, 32, %s17_s13, [#allocation3]  }
  0x11   :  { %109 = dma.done.wait [#allocation3], 32  }
  0x12   :  { %110 = vsyncadd [#allocation3], 4294967264  ;;  %s114_s24 = smov [#allocation5]   ;;  %v27_v0 = vld [vmem:[#allocation2] sm:$0x3]  ;;  %vm44_vm0 = vcmask 254976  }
  0x13   :  { %s52_s25 = sshll.u32 %s114_s24, 4  ;;  %v61_v1 = vld [vmem:[%s166_s1] ss:$0 sm:$0xff]  ;;  %s53_s25 = int_to_ptr.vmem [resolvable:$true] %s52_s25 }
  0x14   :  { %v62_v2 = vld [vmem:[%s167_s2] ss:$0 sm:$0xff]  ;;  %v35_v3 = vmul.f32 %v61_v1, %v27_v0  ;;  %s87_s30 = scalar_lea.vmem %s53_s25, 32  ;;  %p92_p9 = scmp.lt.s32.totalorder %s53_s25, %s53_s25 }
  0x15   :  { %p88_p8 = scmp.ne.s32.totalorder %s53_s25, %s87_s30  ;;  %p93_p10 = scmp.lt.s32.totalorder %s87_s30, %s87_s30 }
  0x16   :  { %v43_v4 = vadd.f32 %v62_v2, %v35_v3 }
  0x17   :  { %p94_p11 = por %p93_p10, %p92_p9 }
  0x18   :  { %45 = vst.msk [vmem:[#allocation5] sm:$0x3] %vm44_vm0, %v43_v4 }
  0x19   :  { %p95_p12 = pnand %p94_p11, %p88_p8 }
  0x1b   :  { %98 = shalt.err (!%p95_p12)
}
  0x1c   :  { %s99_s1 = scalar_lea.hbm %s168_s3, 32 }
  0x1d   :  { %p100_p13 = scmp.ne.s32.totalorder %s168_s3, %s99_s1  ;;  %p103_p0 = scmp.lt.u32.totalorder %s99_s1, %s168_s3 }
  0x1f   :  { %p105_p1 = pnand %p103_p0, %p100_p13 }
  0x21   :  { %108 = shalt.err (!%p105_p1)
}
  0x22   :  { %55 = dma.vmem_to_hbm [thread:$0]  %s53_s25, 32, %s168_s3, [#allocation4]  }
  0x23   :  { %111 = dma.done.wait [#allocation4], 32  }
  0x24   :  { %112 = vsyncadd [#allocation4], 4294967264 }
  0x25   :  { %59 = vsyncpa [#allocation3], 1 }
  0x26   :  { %60 = vsyncpa [#allocation4], 1 }

</bundles_post_ra>
